<compile_context>
chip_gen: v6e
topology: v6e:2x2x1
jax: 0.10.0
libtpu: 0.0.40
codegen_flags: <defaults>
</compile_context>

<pallas_src>
import functools

import jax
import jax.numpy as jnp
from jax.experimental import pallas as pl
from jax.experimental.pallas import tpu as pltpu

_LANE = 128


def _round_up(v, m):
    return (v + m - 1) // m * m


def _pad_to(arr, shape):
    return jnp.pad(arr, [(0, s - d) for d, s in zip(arr.shape, shape)])


def _vmem_capacity_bytes():
    try:
        info = pltpu.get_tpu_info()
        return int(getattr(info, "vmem_capacity_bytes", 64 * 1024 * 1024))
    except Exception:
        return 64 * 1024 * 1024  # conservative (v7x per-TensorCore)


# --------------------------------------------------------------------------
# Fully fused kernel: all layers in one pallas_call, everything VMEM-resident.
# --------------------------------------------------------------------------
def _gcn_fused_kernel(*refs, orders, has_rs):
    """refs = (a, x, [rowsum(A)], w0, b0, w1, b1, ..., o).

    Weights are pre-transposed (F_in_pad, F_out_pad) and pre-cast on the host.
    Matmul operands share a_ref.dtype (bf16 or f32); accumulation is f32.
    """
    a_ref, x_ref = refs[0], refs[1]
    idx = 2
    rs = None
    if has_rs:
        rs = refs[2][...]  # (n_pad, 1) f32 rowsum(A), precomputed host-side
        idx = 3
    o_ref = refs[-1]
    wb_refs = refs[idx:-1]
    num_layers = len(orders)
    mm_dtype = a_ref.dtype

    a = a_ref[...]
    x = x_ref[...]
    for i in range(num_layers):
        w = wb_refs[2 * i][...]        # (F_in_pad, F_out_pad), pre-transposed
        b = wb_refs[2 * i + 1][...]    # (1, F_out_pad), f32
        if orders[i]:
            # Padded F_in < padded F_out: contract A against the narrow dim.
            #   A @ (x W + 1 b^T) == (A x) W + rowsum(A) * b
            ax = jnp.dot(a, x, preferred_element_type=jnp.float32)
            x = jnp.dot(ax.astype(mm_dtype), w,
                        preferred_element_type=jnp.float32) + rs * b
        else:
            h = jnp.dot(x, w, preferred_element_type=jnp.float32) + b
            x = jnp.dot(a, h.astype(mm_dtype),
                        preferred_element_type=jnp.float32)
        if i < num_layers - 1:
            x = jnp.maximum(x, 0.0).astype(mm_dtype)  # ReLU + cast for next MXU
    o_ref[...] = x.astype(o_ref.dtype)


def _gcn_fused(a_p, x_p, rs_p, wb_pad, orders, vmem_limit):
    n_pad = a_p.shape[0]
    f_out_pad = wb_pad[-1][0].shape[1]
    has_rs = rs_p is not None

    flat_inputs = [a_p, x_p]
    in_specs = [pl.BlockSpec(a_p.shape, lambda: (0, 0)),
                pl.BlockSpec(x_p.shape, lambda: (0, 0))]
    if has_rs:
        flat_inputs.append(rs_p)
        in_specs.append(pl.BlockSpec(rs_p.shape, lambda: (0, 0)))
    for (wt, bp) in wb_pad:
        flat_inputs += [wt, bp]
        in_specs += [pl.BlockSpec(wt.shape, lambda: (0, 0)),
                     pl.BlockSpec(bp.shape, lambda: (0, 0))]

    item = a_p.dtype.itemsize
    flops = 0
    bytes_accessed = item * (a_p.size + x_p.size) + 4 * n_pad * f_out_pad
    for (wt, bp), reorder in zip(wb_pad, orders):
        fi, fo = wt.shape
        bytes_accessed += wt.dtype.itemsize * wt.size + 4 * bp.size
        if reorder:
            flops += 2 * n_pad * n_pad * fi + 2 * n_pad * fi * fo
        else:
            flops += 2 * n_pad * fi * fo + 2 * n_pad * n_pad * fo

    kernel = functools.partial(_gcn_fused_kernel, orders=tuple(orders),
                               has_rs=has_rs)
    return pl.pallas_call(
        kernel,
        out_shape=jax.ShapeDtypeStruct((n_pad, f_out_pad), jnp.float32),
        in_specs=in_specs,
        out_specs=pl.BlockSpec((n_pad, f_out_pad), lambda: (0, 0)),
        compiler_params=pltpu.CompilerParams(vmem_limit_bytes=int(vmem_limit)),
        cost_estimate=pl.CostEstimate(flops=int(flops), transcendentals=0,
                                      bytes_accessed=int(bytes_accessed)),
    )(*flat_inputs)


# --------------------------------------------------------------------------
# Gridded aggregation kernel for graphs that do not fit VMEM as one block.
#   out = A @ h   (h = x @ W + b precomputed in plain XLA), optional ReLU.
# Grid = (row tiles "parallel", K tiles over A's columns "arbitrary").
# The output block is resident across K and used directly as the accumulator.
# --------------------------------------------------------------------------
def _gcn_aggregate_tiled_kernel(a_ref, h_ref, o_ref, *, apply_relu,
                                h_resident, tk):
    k = pl.program_id(1)

    @pl.when(k == 0)
    def _():
        o_ref[...] = jnp.zeros(o_ref.shape, o_ref.dtype)

    if h_resident:
        start = pl.multiple_of(k * tk, tk)
        h = h_ref[pl.ds(start, tk), :]
    else:
        h = h_ref[...]
    o_ref[...] += jnp.dot(a_ref[...], h, preferred_element_type=jnp.float32)

    if apply_relu:
        @pl.when(k == pl.num_programs(1) - 1)
        def _():
            o_ref[...] = jnp.maximum(o_ref[...], 0.0)


def _choose_tile(n):
    """Pick a large tile (amortize per-step overhead) while keeping padding
    waste modest and >= 2 row tiles so v7x's two TCs both get work."""
    n_pad0 = _round_up(n, _LANE)
    for t in (1024, 512, 256):
        n_pad = _round_up(n_pad0, t)
        if (n_pad - n_pad0) <= max(_LANE, n_pad0 // 8) and n_pad // t >= 2:
            return t, n_pad
    return _LANE, n_pad0


def _gcn_aggregate_tiled(a_p, h_p, tile, apply_relu, vmem_limit):
    n_pad = a_p.shape[0]
    f_pad = h_p.shape[1]
    tm = tk = tile

    # Keep the whole activation h resident in VMEM (DMA'd once per layer)
    # whenever it is small; otherwise stream (tk, f_pad) blocks.
    h_bytes = h_p.size * h_p.dtype.itemsize
    h_resident = h_bytes <= 8 * 1024 * 1024
    if h_resident:
        h_spec = pl.BlockSpec((n_pad, f_pad), lambda i, k: (0, 0))
        h_reads = 1
    else:
        h_spec = pl.BlockSpec((tk, f_pad), lambda i, k: (k, 0))
        h_reads = n_pad // tm

    flops = 2 * n_pad * n_pad * f_pad
    bytes_accessed = (a_p.size * a_p.dtype.itemsize
                      + h_bytes * h_reads + 4 * n_pad * f_pad)

    kernel = functools.partial(_gcn_aggregate_tiled_kernel,
                               apply_relu=apply_relu,
                               h_resident=h_resident, tk=tk)
    return pl.pallas_call(
        kernel,
        out_shape=jax.ShapeDtypeStruct((n_pad, f_pad), jnp.float32),
        grid_spec=pltpu.PrefetchScalarGridSpec(
            num_scalar_prefetch=0,
            grid=(n_pad // tm, n_pad // tk),
            in_specs=[pl.BlockSpec((tm, tk), lambda i, k: (i, k)),  # A tile
                      h_spec],
            out_specs=pl.BlockSpec((tm, f_pad), lambda i, k: (i, 0)),
        ),
        compiler_params=pltpu.CompilerParams(
            dimension_semantics=("parallel", "arbitrary"),
            vmem_limit_bytes=int(vmem_limit),
        ),
        cost_estimate=pl.CostEstimate(flops=int(flops), transcendentals=0,
                                      bytes_accessed=int(bytes_accessed)),
    )(a_p, h_p)


# --------------------------------------------------------------------------
# Parameters / forward / reference
# --------------------------------------------------------------------------
def init_gcn_dense_params(key, in_channels, hidden_channels, out_channels,
                          num_layers):
    """nn.Linear-style params in PyTorch convention: W (F_out, F_in), b (F_out,)."""
    dims = [in_channels] + [hidden_channels] * (num_layers - 1) + [out_channels]
    params = []
    for i in range(num_layers):
        f_in, f_out = dims[i], dims[i + 1]
        key, kw, kb = jax.random.split(key, 3)
        bound = 1.0 / jnp.sqrt(jnp.float32(f_in))
        w = jax.random.uniform(kw, (f_out, f_in), jnp.float32, -bound, bound)
        b = jax.random.uniform(kb, (f_out,), jnp.float32, -bound, bound)
        params.append((w, b))
    return params


def gcn_dense_forward(params, x, adj, *, force_tiled=False, use_bf16=True):
    """GCN_dense.forward in eval mode (dropout / dropout_adj == identity)."""
    n, f_in = x.shape
    f_out = params[-1][0].shape[0]

    mm_dtype = jnp.bfloat16 if use_bf16 else jnp.float32
    in_bytes = 2 if use_bf16 else 4

    # Pre-transpose + pad weights ONCE on the host: stored (F_in_pad, F_out_pad).
    wb_pad, orders = [], []
    for (w, b) in params:
        fo, fi = w.shape
        fi_p, fo_p = _round_up(fi, _LANE), _round_up(fo, _LANE)
        wt = _pad_to(w.T, (fi_p, fo_p))
        bp = _pad_to(b.reshape(1, fo), (1, fo_p))
        wb_pad.append((wt, bp))
        # Reorder only when the PADDED contraction dim actually shrinks.
        orders.append(fi_p < fo_p)

    f_pads = [_round_up(f_in, _LANE)] + [wt.shape[1] for wt, _ in wb_pad]
    f_max = max(f_pads)

    # Generation-aware VMEM budget for the fused path (v5e/v6e: 128 MiB,
    # v7x: 64 MiB per TensorCore).
    vmem_cap = _vmem_capacity_bytes()
    fused_budget = int(vmem_cap * 0.55)
    fused_limit = min(int(vmem_cap * 0.80), 112 * 1024 * 1024)
    tiled_limit = min(int(vmem_cap * 0.75), 48 * 1024 * 1024)

    n_pad = _round_up(n, _LANE)
    # Count Pallas-managed blocks twice (buffering) plus live f32 temporaries.
    fused_bytes = (2 * (in_bytes * (n_pad * n_pad + n_pad * f_pads[0])
                        + sum(in_bytes * wt.size + 4 * bp.size
                              for wt, bp in wb_pad)
                        + 4 * n_pad * f_pads[-1])
                   + 4 * 3 * n_pad * f_max
                   + (8 * n_pad if any(orders) else 0))
    use_fused = (not force_tiled) and fused_bytes <= fused_budget

    adj_f32 = adj.astype(jnp.float32)
    x_f32 = x.astype(jnp.float32)

    if use_fused:
        a_p32 = _pad_to(adj_f32, (n_pad, n_pad))
        # Host-side rowsum only when a layer actually reorders its matmuls.
        rs_p = (jnp.sum(a_p32, axis=-1, keepdims=True)
                if any(orders) else None)
        a_p = a_p32.astype(mm_dtype)
        x_p = _pad_to(x_f32, (n_pad, f_pads[0])).astype(mm_dtype)
        wb_in = [(wt.astype(mm_dtype), bp) for wt, bp in wb_pad]
        out_p = _gcn_fused(a_p, x_p, rs_p, wb_in, orders, fused_limit)
        return out_p[:n, :f_out]

    # ---- gridded path: per-layer A @ (x W + b) with the tiny xW+b in XLA ----
    tile, n_pad_t = _choose_tile(n)
    a_p = _pad_to(adj_f32, (n_pad_t, n_pad_t)).astype(mm_dtype)
    h = _pad_to(x_f32, (n_pad_t, f_pads[0]))
    for li, (wt, bp) in enumerate(wb_pad):
        hw = (h @ wt + bp).astype(mm_dtype)  # tiny (n, F_in, F_out) matmul
        h = _gcn_aggregate_tiled(a_p, hw, tile,
                                 apply_relu=(li < len(wb_pad) - 1),
                                 vmem_limit=tiled_limit)
    return h[:n, :f_out]


def gcn_dense_reference(params, x, adj):
    """Pure-JAX reference (same math as the PyTorch module in eval mode)."""
    for (w, b) in params[:-1]:
        x = jnp.maximum(adj @ (x @ w.T + b), 0.0)
    w, b = params[-1]
    return adj @ (x @ w.T + b)


if __name__ == "__main__":
    IN_C, HID_C, OUT_C, NUM_LAYERS = 8, 32, 16, 3

    key = jax.random.PRNGKey(0)
    kx, ka, kp, kx2, ka2, kp2 = jax.random.split(key, 6)
    params = init_gcn_dense_params(kp, IN_C, HID_C, OUT_C, NUM_LAYERS)

    # --- small graph: fully fused single-kernel path ---
    N = 16
    x = jax.random.normal(kx, (N, IN_C), jnp.float32)
    a_raw = jax.random.uniform(ka, (N, N), jnp.float32)
    adj = (a_raw + a_raw.T) * 0.5
    adj = adj / jnp.sum(adj, axis=-1, keepdims=True)
    ref = gcn_dense_reference(params, x, adj)

    out_f32 = jax.block_until_ready(
        gcn_dense_forward(params, x, adj, use_bf16=False))
    assert out_f32.shape == (N, OUT_C)
    assert jnp.allclose(out_f32, ref, atol=1e-3, rtol=1e-3), \
        float(jnp.max(jnp.abs(out_f32 - ref)))

    out_bf16 = jax.block_until_ready(gcn_dense_forward(params, x, adj))
    assert jnp.allclose(out_bf16, ref, atol=5e-2, rtol=5e-2), \
        float(jnp.max(jnp.abs(out_bf16 - ref)))

    # --- wide hidden layer: exercises the reordered (A x) W + rowsum(A) b path ---
    params_wide = init_gcn_dense_params(kp2, IN_C, 256, OUT_C, 2)
    ref_w = gcn_dense_reference(params_wide, x, adj)
    out_w = jax.block_until_ready(
        gcn_dense_forward(params_wide, x, adj, use_bf16=False))
    assert jnp.allclose(out_w, ref_w, atol=1e-3, rtol=1e-3), \
        float(jnp.max(jnp.abs(out_w - ref_w)))

    # --- bigger graph: exercise the gridded accumulator path explicitly ---
    N2 = 300
    x2 = jax.random.normal(kx2, (N2, IN_C), jnp.float32)
    a2 = jax.random.uniform(ka2, (N2, N2), jnp.float32)
    adj2 = (a2 + a2.T) * 0.5
    adj2 = adj2 / jnp.sum(adj2, axis=-1, keepdims=True)
    ref2 = gcn_dense_reference(params, x2, adj2)

    out2_f32 = jax.block_until_ready(
        gcn_dense_forward(params, x2, adj2, force_tiled=True, use_bf16=False))
    assert out2_f32.shape == (N2, OUT_C)
    assert jnp.allclose(out2_f32, ref2, atol=1e-3, rtol=1e-3), \
        float(jnp.max(jnp.abs(out2_f32 - ref2)))

    out2_bf16 = jax.block_until_ready(
        gcn_dense_forward(params, x2, adj2, force_tiled=True))
    assert jnp.allclose(out2_bf16, ref2, atol=5e-2, rtol=5e-2), \
        float(jnp.max(jnp.abs(out2_bf16 - ref2)))

    print("KERNEL_OK")
</pallas_src>

<mosaic_0001>
module attributes {stable_mosaic.version = 11 : i64} {
  func.func @_gcn_fused_kernel(%arg0: memref<128x128xf32, #tpu.memory_space<vmem>>, %arg1: memref<128x128xf32, #tpu.memory_space<vmem>>, %arg2: memref<128x128xf32, #tpu.memory_space<vmem>>, %arg3: memref<1x128xf32, #tpu.memory_space<vmem>>, %arg4: memref<128x128xf32, #tpu.memory_space<vmem>>, %arg5: memref<1x128xf32, #tpu.memory_space<vmem>>, %arg6: memref<128x128xf32, #tpu.memory_space<vmem>>, %arg7: memref<1x128xf32, #tpu.memory_space<vmem>>, %arg8: memref<128x128xf32, #tpu.memory_space<vmem>>) attributes {dimension_semantics = [], scalar_prefetch = 0 : i64, scratch_operands = 0 : i64, tpu.core_type = #tpu.core_type<tc>} {
    %c0 = arith.constant 0 : index
    %c0_0 = arith.constant 0 : index
    %0 = vector.load %arg0[%c0, %c0_0] : memref<128x128xf32, #tpu.memory_space<vmem>>, vector<128x128xf32>
    %c0_1 = arith.constant 0 : index
    %c0_2 = arith.constant 0 : index
    %1 = vector.load %arg1[%c0_1, %c0_2] : memref<128x128xf32, #tpu.memory_space<vmem>>, vector<128x128xf32>
    %c0_3 = arith.constant 0 : index
    %c0_4 = arith.constant 0 : index
    %2 = vector.load %arg2[%c0_3, %c0_4] : memref<128x128xf32, #tpu.memory_space<vmem>>, vector<128x128xf32>
    %c0_5 = arith.constant 0 : index
    %c0_6 = arith.constant 0 : index
    %3 = vector.load %arg3[%c0_5, %c0_6] : memref<1x128xf32, #tpu.memory_space<vmem>>, vector<1x128xf32>
    %cst = arith.constant dense<0.000000e+00> : vector<128x128xf32>
    %4 = tpu.matmul %1, %2, %cst {dimension_numbers = #tpu.dot_dimension_numbers<[1], [0], [0], [1], [0, 0, 1, 1], [], []>} : vector<128x128xf32>, vector<128x128xf32>, vector<128x128xf32> -> vector<128x128xf32>
    %5 = vector.broadcast %3 : vector<1x128xf32> to vector<128x128xf32>
    %6 = arith.addf %4, %5 : vector<128x128xf32>
    %cst_7 = arith.constant dense<0.000000e+00> : vector<128x128xf32>
    %7 = tpu.matmul %0, %6, %cst_7 {dimension_numbers = #tpu.dot_dimension_numbers<[1], [0], [0], [1], [0, 0, 1, 1], [], []>} : vector<128x128xf32>, vector<128x128xf32>, vector<128x128xf32> -> vector<128x128xf32>
    %cst_8 = arith.constant 0.000000e+00 : f32
    %8 = vector.broadcast %cst_8 : f32 to vector<128x128xf32>
    %9 = arith.maximumf %7, %8 : vector<128x128xf32>
    %c0_9 = arith.constant 0 : index
    %c0_10 = arith.constant 0 : index
    %10 = vector.load %arg4[%c0_9, %c0_10] : memref<128x128xf32, #tpu.memory_space<vmem>>, vector<128x128xf32>
    %c0_11 = arith.constant 0 : index
    %c0_12 = arith.constant 0 : index
    %11 = vector.load %arg5[%c0_11, %c0_12] : memref<1x128xf32, #tpu.memory_space<vmem>>, vector<1x128xf32>
    %cst_13 = arith.constant dense<0.000000e+00> : vector<128x128xf32>
    %12 = tpu.matmul %9, %10, %cst_13 {dimension_numbers = #tpu.dot_dimension_numbers<[1], [0], [0], [1], [0, 0, 1, 1], [], []>} : vector<128x128xf32>, vector<128x128xf32>, vector<128x128xf32> -> vector<128x128xf32>
    %13 = vector.broadcast %11 : vector<1x128xf32> to vector<128x128xf32>
    %14 = arith.addf %12, %13 : vector<128x128xf32>
    %cst_14 = arith.constant dense<0.000000e+00> : vector<128x128xf32>
    %15 = tpu.matmul %0, %14, %cst_14 {dimension_numbers = #tpu.dot_dimension_numbers<[1], [0], [0], [1], [0, 0, 1, 1], [], []>} : vector<128x128xf32>, vector<128x128xf32>, vector<128x128xf32> -> vector<128x128xf32>
    %cst_15 = arith.constant 0.000000e+00 : f32
    %16 = vector.broadcast %cst_15 : f32 to vector<128x128xf32>
    %17 = arith.maximumf %15, %16 : vector<128x128xf32>
    %c0_16 = arith.constant 0 : index
    %c0_17 = arith.constant 0 : index
    %18 = vector.load %arg6[%c0_16, %c0_17] : memref<128x128xf32, #tpu.memory_space<vmem>>, vector<128x128xf32>
    %c0_18 = arith.constant 0 : index
    %c0_19 = arith.constant 0 : index
    %19 = vector.load %arg7[%c0_18, %c0_19] : memref<1x128xf32, #tpu.memory_space<vmem>>, vector<1x128xf32>
    %cst_20 = arith.constant dense<0.000000e+00> : vector<128x128xf32>
    %20 = tpu.matmul %17, %18, %cst_20 {dimension_numbers = #tpu.dot_dimension_numbers<[1], [0], [0], [1], [0, 0, 1, 1], [], []>} : vector<128x128xf32>, vector<128x128xf32>, vector<128x128xf32> -> vector<128x128xf32>
    %21 = vector.broadcast %19 : vector<1x128xf32> to vector<128x128xf32>
    %22 = arith.addf %20, %21 : vector<128x128xf32>
    %cst_21 = arith.constant dense<0.000000e+00> : vector<128x128xf32>
    %23 = tpu.matmul %0, %22, %cst_21 {dimension_numbers = #tpu.dot_dimension_numbers<[1], [0], [0], [1], [0, 0, 1, 1], [], []>} : vector<128x128xf32>, vector<128x128xf32>, vector<128x128xf32> -> vector<128x128xf32>
    %c0_22 = arith.constant 0 : index
    %c0_23 = arith.constant 0 : index
    %24 = vector.load %arg8[%c0_22, %c0_23] : memref<128x128xf32, #tpu.memory_space<vmem>>, vector<128x128xf32>
    tpu.vector_store %arg8[%c0_22, %c0_23], %23 {strides = array<i32>} : memref<128x128xf32, #tpu.memory_space<vmem>>, vector<128x128xf32>,
    return
  }
}

</mosaic_0001>

<bundles_post_ra>
// kernel: tpu_custom_call.1
= control target key start
LH: loop header
LB: loop body
LE: loop exit
PB: predicated region body
PF: predicated region fallthrough
CT: control target
= control target key end

     0   :  { %13 = vsyncpa [#allocation3], 0  ;;  %s1981_s0 = inlined_call_operand.hbm [shape: f32[128,128], index: 0, kind: input, shape index: {}]   ;;  %s1982_s1 = inlined_call_operand.hbm [shape: f32[128,128], index: 1, kind: input, shape index: {}]   ;;  %s1983_s2 = inlined_call_operand.hbm [shape: f32[128,128], index: 2, kind: input, shape index: {}]   ;;  %s1984_s3 = inlined_call_operand.vmem [shape: f32[1,128], index: 3, kind: input, shape index: {}]   ;;  %s1985_s4 = inlined_call_operand.hbm [shape: f32[128,128], index: 4, kind: input, shape index: {}]   ;;  %s1986_s5 = inlined_call_operand.vmem [shape: f32[1,128], index: 5, kind: input, shape index: {}]   ;;  %s1987_s6 = inlined_call_operand.hbm [shape: f32[128,128], index: 6, kind: input, shape index: {}]   ;;  %s1988_s7 = inlined_call_operand.vmem [shape: f32[1,128], index: 7, kind: input, shape index: {}]   ;;  %s1989_s8 = inlined_call_operand.hbm [shape: f32[128,128], index: 8, kind: output, shape index: {}]  }
   0x1   :  { %14 = vsyncpa [#allocation6], 0 }
   0x2   :  { %15 = vsyncpa [#allocation9], 0 }
   0x3   :  { %16 = vsyncpa [#allocation4], 0  ;;  %s1803_s27 = smov [#allocation5]   ;;  %s1804_s29 = smov [#allocation8]  }
   0x4   :  { %s34_s28 = sshll.u32 %s1803_s27, 4  ;;  %s60_s30 = sshll.u32 %s1804_s29, 4  ;;  %s35_s28 = int_to_ptr.vmem [resolvable:$true] %s34_s28  ;;  %s61_s30 = int_to_ptr.vmem [resolvable:$true] %s60_s30 }
   0x5   :  { %s1683_s9 = scalar_lea.vmem %s35_s28, 2048  ;;  %p1688_p1 = scmp.lt.s32.totalorder %s35_s28, %s35_s28 }
   0x6   :  { %p1684_p0 = scmp.ne.s32.totalorder %s35_s28, %s1683_s9  ;;  %p1689_p2 = scmp.lt.s32.totalorder %s1683_s9, %s1683_s9 }
   0x8   :  { %p1690_p3 = por %p1689_p2, %p1688_p1 }
   0xa   :  { %p1691_p4 = pnand %p1690_p3, %p1684_p0 }
   0xc   :  { %1694 = shalt.err (!%p1691_p4)
}
   0xd   :  { %s1805_s10 = smov 128   ;;  %s1806_s11 = smov 8  }
   0xe   :  { %40 = dma.hbm_to_vmem [thread:$0]  %s1982_s1, 2048, %s35_s28, [#allocation6], %s1805_s10, %s1805_s10, %s1806_s11  }
   0xf   :  { %s1703_s14 = scalar_lea.vmem %s61_s30, 2048  ;;  %p1708_p6 = scmp.lt.s32.totalorder %s61_s30, %s61_s30 }
  0x10   :  { %p1704_p5 = scmp.ne.s32.totalorder %s61_s30, %s1703_s14  ;;  %p1709_p7 = scmp.lt.s32.totalorder %s1703_s14, %s1703_s14 }
  0x12   :  { %p1710_p8 = por %p1709_p7, %p1708_p6 }
  0x14   :  { %p1711_p9 = pnand %p1710_p8, %p1704_p5 }
  0x16   :  { %1714 = shalt.err (!%p1711_p9)
}
  0x17   :  { %66 = dma.hbm_to_vmem [thread:$0]  %s1985_s4, 2048, %s61_s30, [#allocation9], %s1805_s10, %s1805_s10, %s1806_s11  }
  0x18   :  { %s1807_s17 = smov [#allocation2]   ;;  %s1808_s19 = smov [#allocation7]  }
  0x19   :  { %s22_s18 = sshll.u32 %s1807_s17, 4  ;;  %s46_s20 = sshll.u32 %s1808_s19, 4  ;;  %s23_s18 = int_to_ptr.vmem [resolvable:$true] %s22_s18  ;;  %s47_s20 = int_to_ptr.vmem [resolvable:$true] %s46_s20 }
  0x1a   :  { %s1723_s1 = scalar_lea.vmem %s23_s18, 2048  ;;  %p1728_p11 = scmp.lt.s32.totalorder %s23_s18, %s23_s18 }
  0x1b   :  { %p1724_p10 = scmp.ne.s32.totalorder %s23_s18, %s1723_s1  ;;  %p1729_p12 = scmp.lt.s32.totalorder %s1723_s1, %s1723_s1 }
  0x1d   :  { %p1730_p13 = por %p1729_p12, %p1728_p11 }
  0x1f   :  { %p1731_p0 = pnand %p1730_p13, %p1724_p10 }
  0x21   :  { %1734 = shalt.err (!%p1731_p0)
}
  0x22   :  { %28 = dma.hbm_to_vmem [thread:$0]  %s1981_s0, 2048, %s23_s18, [#allocation3], %s1805_s10, %s1805_s10, %s1806_s11  }
  0x23   :  { %s1743_s4 = scalar_lea.vmem %s47_s20, 2048  ;;  %p1748_p2 = scmp.lt.s32.totalorder %s47_s20, %s47_s20 }
  0x24   :  { %p1744_p1 = scmp.ne.s32.totalorder %s47_s20, %s1743_s4  ;;  %p1749_p3 = scmp.lt.s32.totalorder %s1743_s4, %s1743_s4 }
  0x26   :  { %p1750_p4 = por %p1749_p3, %p1748_p2 }
  0x28   :  { %p1751_p5 = pnand %p1750_p4, %p1744_p1 }
  0x2a   :  { %1754 = shalt.err (!%p1751_p5)
}
  0x2b   :  { %52 = dma.hbm_to_vmem [thread:$0]  %s1983_s2, 2048, %s47_s20, [#allocation6], %s1805_s10, %s1805_s10, %s1806_s11  }
  0x2c   :  { %s1809_s25 = smov [#allocation10]  }
  0x2d   :  { %s74_s26 = sshll.u32 %s1809_s25, 4  ;;  %s75_s26 = int_to_ptr.vmem [resolvable:$true] %s74_s26 }
  0x2e   :  { %s1763_s27 = scalar_lea.vmem %s75_s26, 2048  ;;  %p1768_p7 = scmp.lt.s32.totalorder %s75_s26, %s75_s26 }
  0x2f   :  { %p1764_p6 = scmp.ne.s32.totalorder %s75_s26, %s1763_s27  ;;  %p1769_p8 = scmp.lt.s32.totalorder %s1763_s27, %s1763_s27 }
  0x31   :  { %p1770_p9 = por %p1769_p8, %p1768_p7 }
  0x33   :  { %p1771_p10 = pnand %p1770_p9, %p1764_p6 }
  0x35   :  { %1774 = shalt.err (!%p1771_p10)
}
  0x36   :  { %80 = dma.hbm_to_vmem [thread:$0]  %s1987_s6, 2048, %s75_s26, [#allocation9], %s1805_s10, %s1805_s10, %s1806_s11  }
  0x37   :  { %1795 = dma.done.wait [#allocation3], 2048  }
  0x38   :  { %1796 = vsyncadd [#allocation3], 4294965248 }
  0x39   :  { %1797 = dma.done.wait [#allocation6], 4096  }
  0x3a   :  { %1798 = vsyncadd [#allocation6], 4294963200 }
  0x3b   :  { %1799 = dma.done.wait [#allocation9], 4096  }
  0x3c   :  { %1800 = vsyncadd [#allocation9], 4294963200  ;;  %v145_v0 = vld [vmem:[#allocation7 + $0x78] sm:$0xff]  ;;  %v144_v1 = vld [vmem:[#allocation7 + $0x70] sm:$0xff] }
  0x3d   :  { %1331 = vmatprep.subr.mxu0 %v145_v0  ;;  %v143_v2 = vld [vmem:[#allocation7 + $0x68] sm:$0xff]  ;;  %v142_v3 = vld [vmem:[#allocation7 + $0x60] sm:$0xff]  ;;  %v141_v5 = vld [vmem:[#allocation7 + $0x58] sm:$0xff] }
  0x3e   :  { %1332 = vmatpush3.msra.mxu0 %v145_v0  ;;  %v114_v4 = vld [vmem:[#allocation5] sm:$0xff]  ;;  %v140_v6 = vld [vmem:[#allocation7 + $0x50] sm:$0xff]  ;;  %v139_v7 = vld [vmem:[#allocation7 + $0x48] sm:$0xff] }
  0x3f   :  { %1333 = vmatprep.subr.mxu0 %v144_v1  ;;  %1363 = vmatprep.mubr.f32.mxu0 %v114_v4  ;;  %v138_v8 = vld [vmem:[#allocation7 + $0x40] sm:$0xff]  ;;  %v137_v9 = vld [vmem:[#allocation7 + $0x38] sm:$0xff]  ;;  %v136_v10 = vld [vmem:[#allocation7 + $0x30] sm:$0xff] }
  0x40   :  { %1334 = vmatpush3.msra.mxu0 %v144_v1  ;;  %v135_v11 = vld [vmem:[#allocation7 + $0x28] sm:$0xff]  ;;  %v134_v12 = vld [vmem:[#allocation7 + $0x20] sm:$0xff]  ;;  %v133_v13 = vld [vmem:[#allocation7 + $0x18] sm:$0xff] }
  0x41   :  { %1335 = vmatprep.subr.mxu0 %v143_v2  ;;  %v132_v14 = vld [vmem:[#allocation7 + $0x10] sm:$0xff]  ;;  %v131_v15 = vld [vmem:[#allocation7 + $0x8] sm:$0xff]  ;;  %v130_v16 = vld [vmem:[#allocation7] sm:$0xff] }
  0x42   :  { %1336 = vmatpush3.msra.mxu0 %v143_v2  ;;  %v115_v17 = vld [vmem:[#allocation5 + $0x8] sm:$0xff]  ;;  %v116_v18 = vld [vmem:[#allocation5 + $0x10] sm:$0xff]  ;;  %v117_v19 = vld [vmem:[#allocation5 + $0x18] sm:$0xff] }
  0x43   :  { %1337 = vmatprep.subr.mxu0 %v142_v3  ;;  %v118_v20 = vld [vmem:[#allocation5 + $0x20] sm:$0xff]  ;;  %v119_v21 = vld [vmem:[#allocation5 + $0x28] sm:$0xff]  ;;  %v120_v22 = vld [vmem:[#allocation5 + $0x30] sm:$0xff] }
  0x44   :  { %1338 = vmatpush3.msra.mxu0 %v142_v3  ;;  %v121_v23 = vld [vmem:[#allocation5 + $0x38] sm:$0xff]  ;;  %v122_v24 = vld [vmem:[#allocation5 + $0x40] sm:$0xff]  ;;  %v123_v25 = vld [vmem:[#allocation5 + $0x48] sm:$0xff] }
  0x45   :  { %1339 = vmatprep.subr.mxu0 %v141_v5  ;;  %v124_v26 = vld [vmem:[#allocation5 + $0x50] sm:$0xff]  ;;  %v125_v27 = vld [vmem:[#allocation5 + $0x58] sm:$0xff]  ;;  %v126_v28 = vld [vmem:[#allocation5 + $0x60] sm:$0xff] }
  0x46   :  { %1340 = vmatpush3.msra.mxu0 %v141_v5  ;;  %v127_v29 = vld [vmem:[#allocation5 + $0x68] sm:$0xff]  ;;  %v128_v30 = vld [vmem:[#allocation5 + $0x70] sm:$0xff]  ;;  %v129_v31 = vld [vmem:[#allocation5 + $0x78] sm:$0xff] }
  0x47   :  { %1341 = vmatprep.subr.mxu0 %v140_v6  ;;  %v1886_v32 = vld [vmem:[#allocation2] sm:$0xff]  ;;  %v474_v33 = vld [vmem:[#allocation8 + $0x78] sm:$0xff]  ;;  %v473_v34 = vld [vmem:[#allocation8 + $0x70] sm:$0xff] }
  0x48   :  { %1342 = vmatpush3.msra.mxu0 %v140_v6  ;;  %1419 = vmatprep.mubr.f32.mxu1 %v1886_v32  ;;  %v472_v35 = vld [vmem:[#allocation8 + $0x68] sm:$0xff]  ;;  %v471_v36 = vld [vmem:[#allocation8 + $0x60] sm:$0xff]  ;;  %v470_v37 = vld [vmem:[#allocation8 + $0x58] sm:$0xff] }
  0x49   :  { %1343 = vmatprep.subr.mxu0 %v139_v7  ;;  %v469_v38 = vld [vmem:[#allocation8 + $0x50] sm:$0xff]  ;;  %v468_v39 = vld [vmem:[#allocation8 + $0x48] sm:$0xff]  ;;  %v467_v40 = vld [vmem:[#allocation8 + $0x40] sm:$0xff] }
  0x4a   :  { %1344 = vmatpush3.msra.mxu0 %v139_v7  ;;  %v466_v41 = vld [vmem:[#allocation8 + $0x38] sm:$0xff]  ;;  %v465_v42 = vld [vmem:[#allocation8 + $0x30] sm:$0xff]  ;;  %v464_v43 = vld [vmem:[#allocation8 + $0x28] sm:$0xff] }
  0x4b   :  { %1345 = vmatprep.subr.mxu0 %v138_v8  ;;  %v463_v44 = vld [vmem:[#allocation8 + $0x20] sm:$0xff]  ;;  %v462_v45 = vld [vmem:[#allocation8 + $0x18] sm:$0xff] }
  0x4c   :  { %1346 = vmatpush3.msra.mxu0 %v138_v8  ;;  %v1136_v60 = vld [vmem:[%s1984_s3] ss:$0 sm:$0xff] }
  0x4d   :  { %1347 = vmatprep.subr.mxu0 %v137_v9 }
  0x4e   :  { %1348 = vmatpush3.msra.mxu0 %v137_v9 }
  0x4f   :  { %1349 = vmatprep.subr.mxu0 %v136_v10 }
  0x50   :  { %1350 = vmatpush3.msra.mxu0 %v136_v10 }
  0x51   :  { %1351 = vmatprep.subr.mxu0 %v135_v11 }
  0x52   :  { %1352 = vmatpush3.msra.mxu0 %v135_v11 }
  0x53   :  { %1353 = vmatprep.subr.mxu0 %v134_v12 }
  0x54   :  { %1354 = vmatpush3.msra.mxu0 %v134_v12 }
  0x55   :  { %1355 = vmatprep.subr.mxu0 %v133_v13 }
  0x56   :  { %1356 = vmatpush3.msra.mxu0 %v133_v13 }
  0x57   :  { %1357 = vmatprep.subr.mxu0 %v132_v14 }
  0x58   :  { %1358 = vmatpush3.msra.mxu0 %v132_v14 }
  0x59   :  { %1359 = vmatprep.subr.mxu0 %v131_v15 }
  0x5a   :  { %1360 = vmatpush3.msra.mxu0 %v131_v15  ;;  %v1892_v15 = vld [vmem:[#allocation2 + $0x8] sm:$0xff] }
  0x5b   :  { %1361 = vmatprep.subr.mxu0 %v130_v16 }
  0x5c   :  { %1362 = vmatpush3.msra.mxu0 %v130_v16  ;;  %v1894_v16 = vld [vmem:[#allocation2 + $0x10] sm:$0xff] }
  0x5d   :  { %1364 = vmatmul.mubr.f32.vlgmr.msra.gmra.mxu0 %v115_v17  ;;  %1443 = vmatprep.subr.mxu0 %v474_v33  ;;  %v1898_v17 = vld [vmem:[#allocation2 + $0x18] sm:$0xff] }
  0x5e   :  { %1366 = vmatprep.mubr.f32.mxu0 %v116_v18  ;;  %1444 = vmatpush3.msra.mxu0 %v474_v33  ;;  %v1900_v18 = vld [vmem:[#allocation2 + $0x20] sm:$0xff] }
  0x5f   :  { %1445 = vmatprep.subr.mxu0 %v473_v34  ;;  %v459_v33 = vld [vmem:[#allocation8] sm:$0xff] }
  0x60   :  { %1446 = vmatpush3.msra.mxu0 %v473_v34 }
  0x61   :  { %1367 = vmatmul.mubr.f32.gmra.mxu0 %v117_v19  ;;  %1447 = vmatprep.subr.mxu0 %v472_v35  ;;  %v1904_v19 = vld [vmem:[#allocation2 + $0x28] sm:$0xff] }
  0x62   :  { %1369 = vmatprep.mubr.f32.mxu0 %v118_v20  ;;  %1448 = vmatpush3.msra.mxu0 %v472_v35  ;;  %v1906_v20 = vld [vmem:[#allocation2 + $0x30] sm:$0xff] }
  0x63   :  { %1449 = vmatprep.subr.mxu0 %v471_v36 }
  0x64   :  { %1450 = vmatpush3.msra.mxu0 %v471_v36 }
  0x65   :  { %1370 = vmatmul.mubr.f32.gmra.mxu0 %v119_v21  ;;  %1451 = vmatprep.subr.mxu0 %v470_v37  ;;  %v1910_v21 = vld [vmem:[#allocation2 + $0x38] sm:$0xff] }
  0x66   :  { %1372 = vmatprep.mubr.f32.mxu0 %v120_v22  ;;  %1452 = vmatpush3.msra.mxu0 %v470_v37  ;;  %v1912_v22 = vld [vmem:[#allocation2 + $0x40] sm:$0xff] }
  0x67   :  { %1453 = vmatprep.subr.mxu0 %v469_v38 }
  0x68   :  { %1454 = vmatpush3.msra.mxu0 %v469_v38 }
  0x69   :  { %1373 = vmatmul.mubr.f32.gmra.mxu0 %v121_v23  ;;  %1455 = vmatprep.subr.mxu0 %v468_v39  ;;  %v1916_v23 = vld [vmem:[#allocation2 + $0x48] sm:$0xff] }
  0x6a   :  { %1375 = vmatprep.mubr.f32.mxu0 %v122_v24  ;;  %1456 = vmatpush3.msra.mxu0 %v468_v39  ;;  %v1918_v24 = vld [vmem:[#allocation2 + $0x50] sm:$0xff] }
  0x6b   :  { %1457 = vmatprep.subr.mxu0 %v467_v40 }
  0x6c   :  { %1458 = vmatpush3.msra.mxu0 %v467_v40 }
  0x6d   :  { %1376 = vmatmul.mubr.f32.gmra.mxu0 %v123_v25  ;;  %1459 = vmatprep.subr.mxu0 %v466_v41  ;;  %v1922_v25 = vld [vmem:[#allocation2 + $0x58] sm:$0xff] }
  0x6e   :  { %1378 = vmatprep.mubr.f32.mxu0 %v124_v26  ;;  %1460 = vmatpush3.msra.mxu0 %v466_v41  ;;  %v1924_v26 = vld [vmem:[#allocation2 + $0x60] sm:$0xff] }
  0x6f   :  { %1461 = vmatprep.subr.mxu0 %v465_v42 }
  0x70   :  { %1462 = vmatpush3.msra.mxu0 %v465_v42 }
  0x71   :  { %1379 = vmatmul.mubr.f32.gmra.mxu0 %v125_v27  ;;  %1463 = vmatprep.subr.mxu0 %v464_v43  ;;  %v1928_v27 = vld [vmem:[#allocation2 + $0x68] sm:$0xff] }
  0x72   :  { %1381 = vmatprep.mubr.f32.mxu0 %v126_v28  ;;  %1464 = vmatpush3.msra.mxu0 %v464_v43  ;;  %v1930_v28 = vld [vmem:[#allocation2 + $0x70] sm:$0xff] }
  0x73   :  { %1465 = vmatprep.subr.mxu0 %v463_v44 }
  0x74   :  { %1466 = vmatpush3.msra.mxu0 %v463_v44 }
  0x75   :  { %1382 = vmatmul.mubr.f32.gmra.mxu0 %v127_v29  ;;  %1467 = vmatprep.subr.mxu0 %v462_v45  ;;  %v1934_v29 = vld [vmem:[#allocation2 + $0x78] sm:$0xff] }
  0x76   :  { %1384 = vmatprep.mubr.f32.mxu0 %v128_v30  ;;  %1468 = vmatpush3.msra.mxu0 %v462_v45  ;;  %v461_v30 = vld [vmem:[#allocation8 + $0x10] sm:$0xff] }
  0x77   :  { %1469 = vmatprep.subr.mxu0 %v461_v30 }
  0x78   :  { %1470 = vmatpush3.msra.mxu0 %v461_v30 }
  0x79   :  { %1385 = vmatmul.mubr.f32.gmra.mxu0 %v129_v31  ;;  %v460_v31 = vld [vmem:[#allocation8 + $0x8] sm:$0xff] }
  0x7a   :  { %1471 = vmatprep.subr.mxu0 %v460_v31 }
  0x7b   :  { %1472 = vmatpush3.msra.mxu0 %v460_v31 }
  0x7c   :  { %1473 = vmatprep.subr.mxu0 %v459_v33 }
  0x7d   :  { %1474 = vmatpush3.msra.mxu0 %v459_v33 }
 0x11d   :  { %v1365_v46 = vpop.f32.mrf.mxu0 }
 0x11e   :  { %v225_v13 = vadd.f32 %v1365_v46, %v1136_v60 }
 0x11f   :  { %v219_v47 = vpop.f32.mrf.mxu0 }
 0x120   :  { %v220_v14 = vadd.f32 %v1136_v60, %v219_v47 }
 0x121   :  { %v1368_v48 = vpop.f32.mrf.mxu0 }
 0x122   :  { %v235_v11 = vadd.f32 %v1368_v48, %v1136_v60 }
 0x123   :  { %v229_v49 = vpop.f32.mrf.mxu0 }
 0x124   :  { %v230_v12 = vadd.f32 %v1136_v60, %v229_v49 }
 0x125   :  { %v1371_v50 = vpop.f32.mrf.mxu0 }
 0x126   :  { %v245_v9 = vadd.f32 %v1371_v50, %v1136_v60 }
 0x127   :  { %v239_v51 = vpop.f32.mrf.mxu0 }
 0x128   :  { %v240_v10 = vadd.f32 %v1136_v60, %v239_v51 }
 0x129   :  { %v1374_v52 = vpop.f32.mrf.mxu0 }
 0x12a   :  { %v255_v7 = vadd.f32 %v1374_v52, %v1136_v60 }
 0x12b   :  { %v249_v53 = vpop.f32.mrf.mxu0 }
 0x12c   :  { %v250_v8 = vadd.f32 %v1136_v60, %v249_v53 }
 0x12d   :  { %v1377_v54 = vpop.f32.mrf.mxu0 }
 0x12e   :  { %v265_v5 = vadd.f32 %v1377_v54, %v1136_v60 }
 0x12f   :  { %v259_v55 = vpop.f32.mrf.mxu0 }
 0x130   :  { %v260_v6 = vadd.f32 %v1136_v60, %v259_v55 }
 0x131   :  { %v1380_v56 = vpop.f32.mrf.mxu0 }
 0x132   :  { %v275_v3 = vadd.f32 %v1380_v56, %v1136_v60 }
 0x133   :  { %v269_v57 = vpop.f32.mrf.mxu0 }
 0x134   :  { %v270_v4 = vadd.f32 %v1136_v60, %v269_v57 }
 0x135   :  { %v1383_v58 = vpop.f32.mrf.mxu0 }
 0x136   :  { %v285_v1 = vadd.f32 %v1383_v58, %v1136_v60 }
 0x137   :  { %v279_v59 = vpop.f32.mrf.mxu0 }
 0x138   :  { %v280_v2 = vadd.f32 %v1136_v60, %v279_v59 }
 0x139   :  { %v1386_v61 = vpop.f32.mrf.mxu0 }
 0x13a   :  { %v295_v62 = vadd.f32 %v1386_v61, %v1136_v60 }
 0x13b   :  { %v289_v63 = vpop.f32.mrf.mxu0 }
 0x13c   :  { %v290_v0 = vadd.f32 %v1136_v60, %v289_v63  ;;  %1387 = vmatprep.subr.mxu1 %v295_v62 }
 0x13d   :  { %1388 = vmatpush3.msra.mxu1 %v295_v62 }
 0x13e   :  { %1389 = vmatprep.subr.mxu1 %v290_v0 }
 0x13f   :  { %1390 = vmatpush3.msra.mxu1 %v290_v0 }
 0x140   :  { %1391 = vmatprep.subr.mxu1 %v285_v1 }
 0x141   :  { %1392 = vmatpush3.msra.mxu1 %v285_v1 }
 0x142   :  { %1393 = vmatprep.subr.mxu1 %v280_v2 }
 0x143   :  { %1394 = vmatpush3.msra.mxu1 %v280_v2  ;;  %v803_v2 = vld [vmem:[#allocation10 + $0x78] sm:$0xff] }
 0x144   :  { %1395 = vmatprep.subr.mxu1 %v275_v3  ;;  %1555 = vmatprep.subr.mxu0 %v803_v2 }
 0x145   :  { %1396 = vmatpush3.msra.mxu1 %v275_v3  ;;  %v802_v3 = vld [vmem:[#allocation10 + $0x70] sm:$0xff] }
 0x146   :  { %1397 = vmatprep.subr.mxu1 %v270_v4 }
 0x147   :  { %1398 = vmatpush3.msra.mxu1 %v270_v4  ;;  %v801_v4 = vld [vmem:[#allocation10 + $0x68] sm:$0xff] }
 0x148   :  { %1399 = vmatprep.subr.mxu1 %v265_v5 }
 0x149   :  { %1400 = vmatpush3.msra.mxu1 %v265_v5  ;;  %v800_v5 = vld [vmem:[#allocation10 + $0x60] sm:$0xff] }
 0x14a   :  { %1401 = vmatprep.subr.mxu1 %v260_v6 }
 0x14b   :  { %1402 = vmatpush3.msra.mxu1 %v260_v6  ;;  %v799_v6 = vld [vmem:[#allocation10 + $0x58] sm:$0xff] }
 0x14c   :  { %1403 = vmatprep.subr.mxu1 %v255_v7 }
 0x14d   :  { %1404 = vmatpush3.msra.mxu1 %v255_v7  ;;  %v798_v7 = vld [vmem:[#allocation10 + $0x50] sm:$0xff] }
 0x14e   :  { %1405 = vmatprep.subr.mxu1 %v250_v8 }
 0x14f   :  { %1406 = vmatpush3.msra.mxu1 %v250_v8  ;;  %v797_v8 = vld [vmem:[#allocation10 + $0x48] sm:$0xff] }
 0x150   :  { %1407 = vmatprep.subr.mxu1 %v245_v9 }
 0x151   :  { %1408 = vmatpush3.msra.mxu1 %v245_v9  ;;  %v796_v9 = vld [vmem:[#allocation10 + $0x40] sm:$0xff] }
 0x152   :  { %1409 = vmatprep.subr.mxu1 %v240_v10 }
 0x153   :  { %1410 = vmatpush3.msra.mxu1 %v240_v10  ;;  %v795_v10 = vld [vmem:[#allocation10 + $0x38] sm:$0xff] }
 0x154   :  { %1411 = vmatprep.subr.mxu1 %v235_v11 }
 0x155   :  { %1412 = vmatpush3.msra.mxu1 %v235_v11  ;;  %v794_v11 = vld [vmem:[#allocation10 + $0x30] sm:$0xff] }
 0x156   :  { %1413 = vmatprep.subr.mxu1 %v230_v12 }
 0x157   :  { %1414 = vmatpush3.msra.mxu1 %v230_v12  ;;  %v793_v12 = vld [vmem:[#allocation10 + $0x28] sm:$0xff] }
 0x158   :  { %1415 = vmatprep.subr.mxu1 %v225_v13 }
 0x159   :  { %1416 = vmatpush3.msra.mxu1 %v225_v13  ;;  %v792_v13 = vld [vmem:[#allocation10 + $0x20] sm:$0xff] }
 0x15a   :  { %1417 = vmatprep.subr.mxu1 %v220_v14 }
 0x15b   :  { %1418 = vmatpush3.msra.mxu1 %v220_v14  ;;  %v791_v14 = vld [vmem:[#allocation10 + $0x18] sm:$0xff] }
 0x15c   :  { %1420 = vmatmul.mubr.f32.vlgmr.msra.gmra.mxu1 %v1892_v15 }
 0x15d   :  { %1422 = vmatprep.mubr.f32.mxu1 %v1894_v16 }
 0x160   :  { %1423 = vmatmul.mubr.f32.gmra.mxu1 %v1898_v17 }
 0x161   :  { %1425 = vmatprep.mubr.f32.mxu1 %v1900_v18 }
 0x164   :  { %1426 = vmatmul.mubr.f32.gmra.mxu1 %v1904_v19 }
 0x165   :  { %1428 = vmatprep.mubr.f32.mxu1 %v1906_v20 }
 0x168   :  { %1429 = vmatmul.mubr.f32.gmra.mxu1 %v1910_v21 }
 0x169   :  { %1431 = vmatprep.mubr.f32.mxu1 %v1912_v22 }
 0x16c   :  { %1432 = vmatmul.mubr.f32.gmra.mxu1 %v1916_v23 }
 0x16d   :  { %1434 = vmatprep.mubr.f32.mxu1 %v1918_v24 }
 0x170   :  { %1435 = vmatmul.mubr.f32.gmra.mxu1 %v1922_v25 }
 0x171   :  { %1437 = vmatprep.mubr.f32.mxu1 %v1924_v26 }
 0x174   :  { %1438 = vmatmul.mubr.f32.gmra.mxu1 %v1928_v27 }
 0x175   :  { %1440 = vmatprep.mubr.f32.mxu1 %v1930_v28 }
 0x178   :  { %1441 = vmatmul.mubr.f32.gmra.mxu1 %v1934_v29 }
 0x179   :  { %1531 = vmatprep.mubr.f32.mxu1 %v1886_v32 }
 0x21c   :  { %v1421_v34 = vpop.f32.mrf.mxu1 }
 0x21d   :  { %v444_v37 = vmax.f32 %v1421_v34, 0.0 }
 0x21e   :  { %v364_v35 = vpop.f32.mrf.mxu1 }
 0x21f   :  { %v443_v36 = vmax.f32 %v364_v35, 0.0 }
 0x220   :  { %v1424_v38 = vpop.f32.mrf.mxu1 }
 0x221   :  { %1475 = vmatprep.mubr.f32.mxu0 %v443_v36  ;;  %v446_v41 = vmax.f32 %v1424_v38, 0.0 }
 0x222   :  { %v374_v39 = vpop.f32.mrf.mxu1  ;;  %1476 = vmatmul.mubr.f32.vlgmr.msra.gmra.mxu0 %v444_v37 }
 0x223   :  { %v445_v40 = vmax.f32 %v374_v39, 0.0  ;;  %1556 = vmatpush3.msra.mxu0 %v803_v2  ;;  %v788_v2 = vld [vmem:[#allocation10] sm:$0xff] }
 0x224   :  { %v1427_v42 = vpop.f32.mrf.mxu1  ;;  %1557 = vmatprep.subr.mxu0 %v802_v3 }
 0x225   :  { %1478 = vmatprep.mubr.f32.mxu0 %v445_v40  ;;  %v448_v45 = vmax.f32 %v1427_v42, 0.0  ;;  %1558 = vmatpush3.msra.mxu0 %v802_v3 }
 0x226   :  { %v384_v43 = vpop.f32.mrf.mxu1  ;;  %1479 = vmatmul.mubr.f32.gmra.mxu0 %v446_v41  ;;  %1559 = vmatprep.subr.mxu0 %v801_v4 }
 0x227   :  { %v447_v44 = vmax.f32 %v384_v43, 0.0  ;;  %1560 = vmatpush3.msra.mxu0 %v801_v4 }
 0x228   :  { %v1430_v46 = vpop.f32.mrf.mxu1  ;;  %1561 = vmatprep.subr.mxu0 %v800_v5 }
 0x229   :  { %1481 = vmatprep.mubr.f32.mxu0 %v447_v44  ;;  %v450_v49 = vmax.f32 %v1430_v46, 0.0  ;;  %1562 = vmatpush3.msra.mxu0 %v800_v5 }
 0x22a   :  { %v394_v47 = vpop.f32.mrf.mxu1  ;;  %1482 = vmatmul.mubr.f32.gmra.mxu0 %v448_v45  ;;  %1563 = vmatprep.subr.mxu0 %v799_v6  ;;  %v1137_v45 = vld [vmem:[%s1986_s5] ss:$0 sm:$0xff] }
 0x22b   :  { %v449_v48 = vmax.f32 %v394_v47, 0.0  ;;  %1564 = vmatpush3.msra.mxu0 %v799_v6 }
 0x22c   :  { %v1433_v50 = vpop.f32.mrf.mxu1  ;;  %1565 = vmatprep.subr.mxu0 %v798_v7 }
 0x22d   :  { %1484 = vmatprep.mubr.f32.mxu0 %v449_v48  ;;  %v452_v53 = vmax.f32 %v1433_v50, 0.0  ;;  %1566 = vmatpush3.msra.mxu0 %v798_v7 }
 0x22e   :  { %v404_v51 = vpop.f32.mrf.mxu1  ;;  %1485 = vmatmul.mubr.f32.gmra.mxu0 %v450_v49  ;;  %1567 = vmatprep.subr.mxu0 %v797_v8 }
 0x22f   :  { %v451_v52 = vmax.f32 %v404_v51, 0.0  ;;  %1568 = vmatpush3.msra.mxu0 %v797_v8 }
 0x230   :  { %v1436_v54 = vpop.f32.mrf.mxu1  ;;  %1569 = vmatprep.subr.mxu0 %v796_v9 }
 0x231   :  { %1487 = vmatprep.mubr.f32.mxu0 %v451_v52  ;;  %v454_v57 = vmax.f32 %v1436_v54, 0.0  ;;  %1570 = vmatpush3.msra.mxu0 %v796_v9 }
 0x232   :  { %v414_v55 = vpop.f32.mrf.mxu1  ;;  %1488 = vmatmul.mubr.f32.gmra.mxu0 %v452_v53  ;;  %1571 = vmatprep.subr.mxu0 %v795_v10 }
 0x233   :  { %v453_v56 = vmax.f32 %v414_v55, 0.0  ;;  %1572 = vmatpush3.msra.mxu0 %v795_v10 }
 0x234   :  { %v1439_v58 = vpop.f32.mrf.mxu1  ;;  %1573 = vmatprep.subr.mxu0 %v794_v11 }
 0x235   :  { %1490 = vmatprep.mubr.f32.mxu0 %v453_v56  ;;  %v456_v61 = vmax.f32 %v1439_v58, 0.0  ;;  %1574 = vmatpush3.msra.mxu0 %v794_v11 }
 0x236   :  { %v424_v59 = vpop.f32.mrf.mxu1  ;;  %1491 = vmatmul.mubr.f32.gmra.mxu0 %v454_v57  ;;  %1575 = vmatprep.subr.mxu0 %v793_v12 }
 0x237   :  { %v455_v60 = vmax.f32 %v424_v59, 0.0  ;;  %1576 = vmatpush3.msra.mxu0 %v793_v12 }
 0x238   :  { %v1442_v62 = vpop.f32.mrf.mxu1  ;;  %1577 = vmatprep.subr.mxu0 %v792_v13 }
 0x239   :  { %1493 = vmatprep.mubr.f32.mxu0 %v455_v60  ;;  %v458_v1 = vmax.f32 %v1442_v62, 0.0  ;;  %1578 = vmatpush3.msra.mxu0 %v792_v13 }
 0x23a   :  { %v434_v63 = vpop.f32.mrf.mxu1  ;;  %1494 = vmatmul.mubr.f32.gmra.mxu0 %v456_v61  ;;  %1579 = vmatprep.subr.mxu0 %v791_v14 }
 0x23b   :  { %v457_v0 = vmax.f32 %v434_v63, 0.0  ;;  %1580 = vmatpush3.msra.mxu0 %v791_v14 }
 0x23d   :  { %1496 = vmatprep.mubr.f32.mxu0 %v457_v0  ;;  %v790_v0 = vld [vmem:[#allocation10 + $0x10] sm:$0xff] }
 0x23e   :  { %1497 = vmatmul.mubr.f32.gmra.mxu0 %v458_v1  ;;  %1581 = vmatprep.subr.mxu0 %v790_v0  ;;  %v789_v1 = vld [vmem:[#allocation10 + $0x8] sm:$0xff] }
 0x23f   :  { %1582 = vmatpush3.msra.mxu0 %v790_v0  ;;  %v1138_v0 = vld [vmem:[%s1988_s7] ss:$0 sm:$0xff]  ;;  %s1810_s7 = smov [#allocation11]  }
 0x240   :  { %1583 = vmatprep.subr.mxu0 %v789_v1  ;;  %s1122_s9 = sshll.u32 %s1810_s7, 4  ;;  %s1123_s9 = int_to_ptr.vmem [resolvable:$true] %s1122_s9 }
 0x241   :  { %1584 = vmatpush3.msra.mxu0 %v789_v1  ;;  %s1775_s12 = scalar_lea.vmem %s1123_s9, 2048  ;;  %p1780_p12 = scmp.lt.s32.totalorder %s1123_s9, %s1123_s9 }
 0x242   :  { %1585 = vmatprep.subr.mxu0 %v788_v2  ;;  %p1776_p11 = scmp.ne.s32.totalorder %s1123_s9, %s1775_s12  ;;  %p1781_p13 = scmp.lt.s32.totalorder %s1775_s12, %s1775_s12 }
 0x243   :  { %1586 = vmatpush3.msra.mxu0 %v788_v2 }
 0x244   :  { %p1782_p0 = por %p1781_p13, %p1780_p12 }
 0x246   :  { %p1783_p1 = pnand %p1782_p0, %p1776_p11 }
 0x2e2   :  { %v1477_v30 = vpop.f32.mrf.mxu0 }
 0x2e3   :  { %v554_v62 = vadd.f32 %v1477_v30, %v1137_v45 }
 0x2e4   :  { %v548_v31 = vpop.f32.mrf.mxu0 }
 0x2e5   :  { %v549_v63 = vadd.f32 %v1137_v45, %v548_v31 }
 0x2e6   :  { %v1480_v33 = vpop.f32.mrf.mxu0 }
 0x2e7   :  { %v564_v60 = vadd.f32 %v1480_v33, %v1137_v45 }
 0x2e8   :  { %v558_v34 = vpop.f32.mrf.mxu0 }
 0x2e9   :  { %v559_v61 = vadd.f32 %v1137_v45, %v558_v34 }
 0x2ea   :  { %v1483_v35 = vpop.f32.mrf.mxu0 }
 0x2eb   :  { %v574_v58 = vadd.f32 %v1483_v35, %v1137_v45 }
 0x2ec   :  { %v568_v36 = vpop.f32.mrf.mxu0 }
 0x2ed   :  { %v569_v59 = vadd.f32 %v1137_v45, %v568_v36 }
 0x2ee   :  { %v1486_v37 = vpop.f32.mrf.mxu0 }
 0x2ef   :  { %v584_v56 = vadd.f32 %v1486_v37, %v1137_v45 }
 0x2f0   :  { %v578_v38 = vpop.f32.mrf.mxu0 }
 0x2f1   :  { %v579_v57 = vadd.f32 %v1137_v45, %v578_v38 }
 0x2f2   :  { %v1489_v39 = vpop.f32.mrf.mxu0 }
 0x2f3   :  { %v594_v54 = vadd.f32 %v1489_v39, %v1137_v45 }
 0x2f4   :  { %v588_v40 = vpop.f32.mrf.mxu0 }
 0x2f5   :  { %v589_v55 = vadd.f32 %v1137_v45, %v588_v40 }
 0x2f6   :  { %v1492_v41 = vpop.f32.mrf.mxu0 }
 0x2f7   :  { %v604_v52 = vadd.f32 %v1492_v41, %v1137_v45 }
 0x2f8   :  { %v598_v42 = vpop.f32.mrf.mxu0 }
 0x2f9   :  { %v599_v53 = vadd.f32 %v1137_v45, %v598_v42 }
 0x2fa   :  { %v1495_v43 = vpop.f32.mrf.mxu0 }
 0x2fb   :  { %v614_v50 = vadd.f32 %v1495_v43, %v1137_v45 }
 0x2fc   :  { %v608_v44 = vpop.f32.mrf.mxu0 }
 0x2fd   :  { %v609_v51 = vadd.f32 %v1137_v45, %v608_v44 }
 0x2fe   :  { %v1498_v46 = vpop.f32.mrf.mxu0 }
 0x2ff   :  { %v624_v47 = vadd.f32 %v1498_v46, %v1137_v45 }
 0x300   :  { %v618_v48 = vpop.f32.mrf.mxu0 }
 0x301   :  { %v619_v49 = vadd.f32 %v1137_v45, %v618_v48  ;;  %1499 = vmatprep.subr.mxu1 %v624_v47 }
 0x302   :  { %1500 = vmatpush3.msra.mxu1 %v624_v47 }
 0x303   :  { %1501 = vmatprep.subr.mxu1 %v619_v49 }
 0x304   :  { %1502 = vmatpush3.msra.mxu1 %v619_v49 }
 0x305   :  { %1503 = vmatprep.subr.mxu1 %v614_v50 }
 0x306   :  { %1504 = vmatpush3.msra.mxu1 %v614_v50 }
 0x307   :  { %1505 = vmatprep.subr.mxu1 %v609_v51 }
 0x308   :  { %1506 = vmatpush3.msra.mxu1 %v609_v51 }
 0x309   :  { %1507 = vmatprep.subr.mxu1 %v604_v52 }
 0x30a   :  { %1508 = vmatpush3.msra.mxu1 %v604_v52 }
 0x30b   :  { %1509 = vmatprep.subr.mxu1 %v599_v53 }
 0x30c   :  { %1510 = vmatpush3.msra.mxu1 %v599_v53 }
 0x30d   :  { %1511 = vmatprep.subr.mxu1 %v594_v54 }
 0x30e   :  { %1512 = vmatpush3.msra.mxu1 %v594_v54 }
 0x30f   :  { %1513 = vmatprep.subr.mxu1 %v589_v55 }
 0x310   :  { %1514 = vmatpush3.msra.mxu1 %v589_v55 }
 0x311   :  { %1515 = vmatprep.subr.mxu1 %v584_v56 }
 0x312   :  { %1516 = vmatpush3.msra.mxu1 %v584_v56 }
 0x313   :  { %1517 = vmatprep.subr.mxu1 %v579_v57 }
 0x314   :  { %1518 = vmatpush3.msra.mxu1 %v579_v57 }
 0x315   :  { %1519 = vmatprep.subr.mxu1 %v574_v58 }
 0x316   :  { %1520 = vmatpush3.msra.mxu1 %v574_v58 }
 0x317   :  { %1521 = vmatprep.subr.mxu1 %v569_v59 }
 0x318   :  { %1522 = vmatpush3.msra.mxu1 %v569_v59 }
 0x319   :  { %1523 = vmatprep.subr.mxu1 %v564_v60 }
 0x31a   :  { %1524 = vmatpush3.msra.mxu1 %v564_v60 }
 0x31b   :  { %1525 = vmatprep.subr.mxu1 %v559_v61 }
 0x31c   :  { %1526 = vmatpush3.msra.mxu1 %v559_v61 }
 0x31d   :  { %1527 = vmatprep.subr.mxu1 %v554_v62 }
 0x31e   :  { %1528 = vmatpush3.msra.mxu1 %v554_v62 }
 0x31f   :  { %1529 = vmatprep.subr.mxu1 %v549_v63 }
 0x320   :  { %1530 = vmatpush3.msra.mxu1 %v549_v63 }
 0x321   :  { %1532 = vmatmul.mubr.f32.vlgmr.msra.gmra.mxu1 %v1892_v15 }
 0x322   :  { %1534 = vmatprep.mubr.f32.mxu1 %v1894_v16 }
 0x325   :  { %1535 = vmatmul.mubr.f32.gmra.mxu1 %v1898_v17 }
 0x326   :  { %1537 = vmatprep.mubr.f32.mxu1 %v1900_v18 }
 0x329   :  { %1538 = vmatmul.mubr.f32.gmra.mxu1 %v1904_v19 }
 0x32a   :  { %1540 = vmatprep.mubr.f32.mxu1 %v1906_v20 }
 0x32d   :  { %1541 = vmatmul.mubr.f32.gmra.mxu1 %v1910_v21 }
 0x32e   :  { %1543 = vmatprep.mubr.f32.mxu1 %v1912_v22 }
 0x331   :  { %1544 = vmatmul.mubr.f32.gmra.mxu1 %v1916_v23 }
 0x332   :  { %1546 = vmatprep.mubr.f32.mxu1 %v1918_v24 }
 0x335   :  { %1547 = vmatmul.mubr.f32.gmra.mxu1 %v1922_v25 }
 0x336   :  { %1549 = vmatprep.mubr.f32.mxu1 %v1924_v26 }
 0x339   :  { %1550 = vmatmul.mubr.f32.gmra.mxu1 %v1928_v27 }
 0x33a   :  { %1552 = vmatprep.mubr.f32.mxu1 %v1930_v28 }
 0x33d   :  { %1553 = vmatmul.mubr.f32.gmra.mxu1 %v1934_v29 }
 0x33e   :  { %1643 = vmatprep.mubr.f32.mxu1 %v1886_v32 }
 0x3e1   :  { %v1533_v3 = vpop.f32.mrf.mxu1 }
 0x3e2   :  { %v773_v6 = vmax.f32 %v1533_v3, 0.0 }
 0x3e3   :  { %v693_v4 = vpop.f32.mrf.mxu1 }
 0x3e4   :  { %v772_v5 = vmax.f32 %v693_v4, 0.0 }
 0x3e5   :  { %v1536_v7 = vpop.f32.mrf.mxu1 }
 0x3e6   :  { %1587 = vmatprep.mubr.f32.mxu0 %v772_v5  ;;  %v775_v10 = vmax.f32 %v1536_v7, 0.0 }
 0x3e7   :  { %v703_v8 = vpop.f32.mrf.mxu1  ;;  %1588 = vmatmul.mubr.f32.vlgmr.msra.gmra.mxu0 %v773_v6 }
 0x3e8   :  { %v774_v9 = vmax.f32 %v703_v8, 0.0 }
 0x3e9   :  { %v1539_v32 = vpop.f32.mrf.mxu1 }
 0x3ea   :  { %1590 = vmatprep.mubr.f32.mxu0 %v774_v9  ;;  %v777_v13 = vmax.f32 %v1539_v32, 0.0 }
 0x3eb   :  { %v713_v11 = vpop.f32.mrf.mxu1  ;;  %1591 = vmatmul.mubr.f32.gmra.mxu0 %v775_v10 }
 0x3ec   :  { %v776_v12 = vmax.f32 %v713_v11, 0.0 }
 0x3ed   :  { %v1542_v14 = vpop.f32.mrf.mxu1 }
 0x3ee   :  { %1593 = vmatprep.mubr.f32.mxu0 %v776_v12  ;;  %v779_v33 = vmax.f32 %v1542_v14, 0.0 }
 0x3ef   :  { %v723_v30 = vpop.f32.mrf.mxu1  ;;  %1594 = vmatmul.mubr.f32.gmra.mxu0 %v777_v13 }
 0x3f0   :  { %v778_v31 = vmax.f32 %v723_v30, 0.0 }
 0x3f1   :  { %v1545_v34 = vpop.f32.mrf.mxu1 }
 0x3f2   :  { %1596 = vmatprep.mubr.f32.mxu0 %v778_v31  ;;  %v781_v37 = vmax.f32 %v1545_v34, 0.0 }
 0x3f3   :  { %v733_v35 = vpop.f32.mrf.mxu1  ;;  %1597 = vmatmul.mubr.f32.gmra.mxu0 %v779_v33 }
 0x3f4   :  { %v780_v36 = vmax.f32 %v733_v35, 0.0 }
 0x3f5   :  { %v1548_v38 = vpop.f32.mrf.mxu1 }
 0x3f6   :  { %1599 = vmatprep.mubr.f32.mxu0 %v780_v36  ;;  %v783_v41 = vmax.f32 %v1548_v38, 0.0 }
 0x3f7   :  { %v743_v39 = vpop.f32.mrf.mxu1  ;;  %1600 = vmatmul.mubr.f32.gmra.mxu0 %v781_v37 }
 0x3f8   :  { %v782_v40 = vmax.f32 %v743_v39, 0.0 }
 0x3f9   :  { %v1551_v42 = vpop.f32.mrf.mxu1 }
 0x3fa   :  { %1602 = vmatprep.mubr.f32.mxu0 %v782_v40  ;;  %v785_v45 = vmax.f32 %v1551_v42, 0.0 }
 0x3fb   :  { %v753_v43 = vpop.f32.mrf.mxu1  ;;  %1603 = vmatmul.mubr.f32.gmra.mxu0 %v783_v41 }
 0x3fc   :  { %v784_v44 = vmax.f32 %v753_v43, 0.0 }
 0x3fd   :  { %v1554_v46 = vpop.f32.mrf.mxu1 }
 0x3fe   :  { %1605 = vmatprep.mubr.f32.mxu0 %v784_v44  ;;  %v787_v49 = vmax.f32 %v1554_v46, 0.0 }
 0x3ff   :  { %v763_v47 = vpop.f32.mrf.mxu1  ;;  %1606 = vmatmul.mubr.f32.gmra.mxu0 %v785_v45 }
 0x400   :  { %v786_v48 = vmax.f32 %v763_v47, 0.0 }
 0x402   :  { %1608 = vmatprep.mubr.f32.mxu0 %v786_v48 }
 0x403   :  { %1609 = vmatmul.mubr.f32.gmra.mxu0 %v787_v49 }
 0x4a7   :  { %v1589_v50 = vpop.f32.mrf.mxu0 }
 0x4a8   :  { %v883_v31 = vadd.f32 %v1589_v50, %v1138_v0 }
 0x4a9   :  { %v877_v51 = vpop.f32.mrf.mxu0 }
 0x4aa   :  { %v878_v33 = vadd.f32 %v1138_v0, %v877_v51 }
 0x4ab   :  { %v1592_v52 = vpop.f32.mrf.mxu0 }
 0x4ac   :  { %v893_v14 = vadd.f32 %v1592_v52, %v1138_v0 }
 0x4ad   :  { %v887_v53 = vpop.f32.mrf.mxu0 }
 0x4ae   :  { %v888_v30 = vadd.f32 %v1138_v0, %v887_v53 }
 0x4af   :  { %v1595_v54 = vpop.f32.mrf.mxu0 }
 0x4b0   :  { %v903_v12 = vadd.f32 %v1595_v54, %v1138_v0 }
 0x4b1   :  { %v897_v55 = vpop.f32.mrf.mxu0 }
 0x4b2   :  { %v898_v13 = vadd.f32 %v1138_v0, %v897_v55 }
 0x4b3   :  { %v1598_v56 = vpop.f32.mrf.mxu0 }
 0x4b4   :  { %v913_v32 = vadd.f32 %v1598_v56, %v1138_v0 }
 0x4b5   :  { %v907_v57 = vpop.f32.mrf.mxu0 }
 0x4b6   :  { %v908_v11 = vadd.f32 %v1138_v0, %v907_v57 }
 0x4b7   :  { %v1601_v58 = vpop.f32.mrf.mxu0 }
 0x4b8   :  { %v923_v9 = vadd.f32 %v1601_v58, %v1138_v0 }
 0x4b9   :  { %v917_v59 = vpop.f32.mrf.mxu0 }
 0x4ba   :  { %v918_v10 = vadd.f32 %v1138_v0, %v917_v59 }
 0x4bb   :  { %v1604_v60 = vpop.f32.mrf.mxu0 }
 0x4bc   :  { %v933_v7 = vadd.f32 %v1604_v60, %v1138_v0 }
 0x4bd   :  { %v927_v61 = vpop.f32.mrf.mxu0 }
 0x4be   :  { %v928_v8 = vadd.f32 %v1138_v0, %v927_v61 }
 0x4bf   :  { %v1607_v62 = vpop.f32.mrf.mxu0 }
 0x4c0   :  { %v943_v5 = vadd.f32 %v1607_v62, %v1138_v0 }
 0x4c1   :  { %v937_v63 = vpop.f32.mrf.mxu0 }
 0x4c2   :  { %v938_v6 = vadd.f32 %v1138_v0, %v937_v63 }
 0x4c3   :  { %v1610_v1 = vpop.f32.mrf.mxu0 }
 0x4c4   :  { %v953_v2 = vadd.f32 %v1610_v1, %v1138_v0 }
 0x4c5   :  { %v947_v3 = vpop.f32.mrf.mxu0 }
 0x4c6   :  { %v948_v4 = vadd.f32 %v1138_v0, %v947_v3  ;;  %1611 = vmatprep.subr.mxu1 %v953_v2 }
 0x4c7   :  { %1612 = vmatpush3.msra.mxu1 %v953_v2 }
 0x4c8   :  { %1613 = vmatprep.subr.mxu1 %v948_v4 }
 0x4c9   :  { %1614 = vmatpush3.msra.mxu1 %v948_v4 }
 0x4ca   :  { %1615 = vmatprep.subr.mxu1 %v943_v5 }
 0x4cb   :  { %1616 = vmatpush3.msra.mxu1 %v943_v5 }
 0x4cc   :  { %1617 = vmatprep.subr.mxu1 %v938_v6 }
 0x4cd   :  { %1618 = vmatpush3.msra.mxu1 %v938_v6 }
 0x4ce   :  { %1619 = vmatprep.subr.mxu1 %v933_v7 }
 0x4cf   :  { %1620 = vmatpush3.msra.mxu1 %v933_v7 }
 0x4d0   :  { %1621 = vmatprep.subr.mxu1 %v928_v8 }
 0x4d1   :  { %1622 = vmatpush3.msra.mxu1 %v928_v8 }
 0x4d2   :  { %1623 = vmatprep.subr.mxu1 %v923_v9 }
 0x4d3   :  { %1624 = vmatpush3.msra.mxu1 %v923_v9 }
 0x4d4   :  { %1625 = vmatprep.subr.mxu1 %v918_v10 }
 0x4d5   :  { %1626 = vmatpush3.msra.mxu1 %v918_v10 }
 0x4d6   :  { %1627 = vmatprep.subr.mxu1 %v913_v32 }
 0x4d7   :  { %1628 = vmatpush3.msra.mxu1 %v913_v32 }
 0x4d8   :  { %1629 = vmatprep.subr.mxu1 %v908_v11 }
 0x4d9   :  { %1630 = vmatpush3.msra.mxu1 %v908_v11 }
 0x4da   :  { %1631 = vmatprep.subr.mxu1 %v903_v12 }
 0x4db   :  { %1632 = vmatpush3.msra.mxu1 %v903_v12 }
 0x4dc   :  { %1633 = vmatprep.subr.mxu1 %v898_v13 }
 0x4dd   :  { %1634 = vmatpush3.msra.mxu1 %v898_v13 }
 0x4de   :  { %1635 = vmatprep.subr.mxu1 %v893_v14 }
 0x4df   :  { %1636 = vmatpush3.msra.mxu1 %v893_v14 }
 0x4e0   :  { %1637 = vmatprep.subr.mxu1 %v888_v30 }
 0x4e1   :  { %1638 = vmatpush3.msra.mxu1 %v888_v30 }
 0x4e2   :  { %1639 = vmatprep.subr.mxu1 %v883_v31 }
 0x4e3   :  { %1640 = vmatpush3.msra.mxu1 %v883_v31 }
 0x4e4   :  { %1641 = vmatprep.subr.mxu1 %v878_v33 }
 0x4e5   :  { %1642 = vmatpush3.msra.mxu1 %v878_v33 }
 0x4e6   :  { %1644 = vmatmul.mubr.f32.vlgmr.msra.gmra.mxu1 %v1892_v15 }
 0x4e7   :  { %1646 = vmatprep.mubr.f32.mxu1 %v1894_v16 }
 0x4ea   :  { %1647 = vmatmul.mubr.f32.gmra.mxu1 %v1898_v17 }
 0x4eb   :  { %1649 = vmatprep.mubr.f32.mxu1 %v1900_v18 }
 0x4ee   :  { %1650 = vmatmul.mubr.f32.gmra.mxu1 %v1904_v19 }
 0x4ef   :  { %1652 = vmatprep.mubr.f32.mxu1 %v1906_v20 }
 0x4f2   :  { %1653 = vmatmul.mubr.f32.gmra.mxu1 %v1910_v21 }
 0x4f3   :  { %1655 = vmatprep.mubr.f32.mxu1 %v1912_v22 }
 0x4f6   :  { %1656 = vmatmul.mubr.f32.gmra.mxu1 %v1916_v23 }
 0x4f7   :  { %1658 = vmatprep.mubr.f32.mxu1 %v1918_v24 }
 0x4fa   :  { %1659 = vmatmul.mubr.f32.gmra.mxu1 %v1922_v25 }
 0x4fb   :  { %1661 = vmatprep.mubr.f32.mxu1 %v1924_v26 }
 0x4fe   :  { %1662 = vmatmul.mubr.f32.gmra.mxu1 %v1928_v27 }
 0x4ff   :  { %1664 = vmatprep.mubr.f32.mxu1 %v1930_v28 }
 0x502   :  { %1665 = vmatmul.mubr.f32.gmra.mxu1 %v1934_v29 }
 0x5a6   :  { %v1645_v15 = vpop.f32.mrf.mxu1 }
 0x5a7   :  { %1102 = vst [vmem:[#allocation11 + $0x8] sm:$0xff] %v1645_v15 }
 0x5a8   :  { %v1022_v16 = vpop.f32.mrf.mxu1 }
 0x5a9   :  { %1101 = vst [vmem:[#allocation11] sm:$0xff] %v1022_v16 }
 0x5aa   :  { %v1648_v17 = vpop.f32.mrf.mxu1 }
 0x5ab   :  { %1104 = vst [vmem:[#allocation11 + $0x18] sm:$0xff] %v1648_v17 }
 0x5ac   :  { %v1032_v18 = vpop.f32.mrf.mxu1 }
 0x5ad   :  { %1103 = vst [vmem:[#allocation11 + $0x10] sm:$0xff] %v1032_v18 }
 0x5ae   :  { %v1651_v19 = vpop.f32.mrf.mxu1 }
 0x5af   :  { %1106 = vst [vmem:[#allocation11 + $0x28] sm:$0xff] %v1651_v19 }
 0x5b0   :  { %v1042_v20 = vpop.f32.mrf.mxu1 }
 0x5b1   :  { %1105 = vst [vmem:[#allocation11 + $0x20] sm:$0xff] %v1042_v20 }
 0x5b2   :  { %v1654_v21 = vpop.f32.mrf.mxu1 }
 0x5b3   :  { %1108 = vst [vmem:[#allocation11 + $0x38] sm:$0xff] %v1654_v21 }
 0x5b4   :  { %v1052_v22 = vpop.f32.mrf.mxu1 }
 0x5b5   :  { %1107 = vst [vmem:[#allocation11 + $0x30] sm:$0xff] %v1052_v22 }
 0x5b6   :  { %v1657_v23 = vpop.f32.mrf.mxu1 }
 0x5b7   :  { %1110 = vst [vmem:[#allocation11 + $0x48] sm:$0xff] %v1657_v23 }
 0x5b8   :  { %v1062_v24 = vpop.f32.mrf.mxu1 }
 0x5b9   :  { %1109 = vst [vmem:[#allocation11 + $0x40] sm:$0xff] %v1062_v24 }
 0x5ba   :  { %v1660_v25 = vpop.f32.mrf.mxu1 }
 0x5bb   :  { %1112 = vst [vmem:[#allocation11 + $0x58] sm:$0xff] %v1660_v25 }
 0x5bc   :  { %v1072_v26 = vpop.f32.mrf.mxu1 }
 0x5bd   :  { %1111 = vst [vmem:[#allocation11 + $0x50] sm:$0xff] %v1072_v26 }
 0x5be   :  { %v1663_v27 = vpop.f32.mrf.mxu1 }
 0x5bf   :  { %1114 = vst [vmem:[#allocation11 + $0x68] sm:$0xff] %v1663_v27 }
 0x5c0   :  { %v1082_v28 = vpop.f32.mrf.mxu1 }
 0x5c1   :  { %1113 = vst [vmem:[#allocation11 + $0x60] sm:$0xff] %v1082_v28 }
 0x5c2   :  { %v1666_v29 = vpop.f32.mrf.mxu1 }
 0x5c3   :  { %1116 = vst [vmem:[#allocation11 + $0x78] sm:$0xff] %v1666_v29 }
 0x5c4   :  { %v1092_v34 = vpop.f32.mrf.mxu1 }
 0x5c5   :  { %1115 = vst [vmem:[#allocation11 + $0x70] sm:$0xff] %v1092_v34 }
 0x5c6   :  { %1786 = shalt.err (!%p1783_p1)
}
 0x5c7   :  { %1128 = dma.vmem_to_hbm [thread:$0]  %s1123_s9, 2048, %s1989_s8, [#allocation4], %s1805_s10, %s1805_s10, %s1806_s11  }
 0x5c8   :  { %1801 = dma.done.wait [#allocation4], 2048  }
 0x5c9   :  { %1802 = vsyncadd [#allocation4], 4294965248 }
 0x5ca   :  { %1132 = vsyncpa [#allocation3], 1 }
 0x5cb   :  { %1133 = vsyncpa [#allocation6], 1 }
 0x5cc   :  { %1134 = vsyncpa [#allocation9], 1 }
 0x5cd   :  { %1135 = vsyncpa [#allocation4], 1 }

</bundles_post_ra>
